<compile_context>
chip_gen: v7x
topology: tpu7x:2x2x1
jax: 0.10.0
libtpu: 0.0.40
codegen_flags: <defaults>
</compile_context>

<pallas_src>
import functools

import jax
import jax.numpy as jnp
from jax import lax
from jax.experimental import pallas as pl
from jax.experimental.pallas import tpu as pltpu


# --------------------------------------------------------------------------- #
# Kernel
# --------------------------------------------------------------------------- #
def _routing_kernel(x_ref, wq_ref, wk_ref, bq_ref, bk_ref, p_ref, *, seq_len):
    """Processes a (tile_rows, D) slab of the flattened (B*S, D) input.

    Invariant (enforced by the wrapper): tile_rows % seq_len == 0 and every
    tile starts on a sequence boundary, so the in-tile roll of K is exact for
    every row except per-sequence first rows, which are overridden to p = 1.
    """
    hp = lax.Precision.HIGHEST               # match the f32 PyTorch semantics
    x = x_ref[...]                                            # (T, D)

    # Two MXU dots (same flops as one fused (T,2D) dot, but no unaligned lane
    # slice afterwards -- safe for any D).  f32 accumulation.
    q = jnp.dot(x, wq_ref[...], preferred_element_type=jnp.float32,
                precision=hp) + bq_ref[...]
    k = jnp.dot(x, wk_ref[...], preferred_element_type=jnp.float32,
                precision=hp) + bk_ref[...]

    # Shift K down by one row (torch.roll(x, 1, dims=1) commuted through Wk).
    # Runs on the XLU; wrapped rows are exactly the rows forced to p = 1 below.
    k = pltpu.roll(k, shift=1, axis=0)

    dot = jnp.sum(q * k, axis=-1, keepdims=True)              # (T, 1)
    qq = jnp.sum(q * q, axis=-1, keepdims=True)
    kk = jnp.sum(k * k, axis=-1, keepdims=True)

    # Cosine sim with eps clamping on each norm via EUP rsqrt
    # (max(sqrt(v), eps) == sqrt(max(v, eps^2))) -- no VPU divide.
    eps2 = jnp.float32(1e-16)                                 # (1e-8)^2
    cos = dot * lax.rsqrt(jnp.maximum(qq, eps2)) * lax.rsqrt(jnp.maximum(kk, eps2))
    p = 0.5 * (1.0 - cos)

    # p[:, 0] = 1.0  -> rows whose index within their sequence is 0.
    local = lax.broadcasted_iota(jnp.int32, p.shape, 0)
    p = jnp.where(local % seq_len == 0, jnp.float32(1.0), p)

    p_ref[...] = p


# --------------------------------------------------------------------------- #
# Tiling / VMEM budgeting helpers
# --------------------------------------------------------------------------- #
def _vmem_cap_bytes():
    """Per-core VMEM capacity (v5e/v6e: 128 MiB, v7x: 64 MiB); conservative
    fallback if the query is unavailable."""
    try:
        return int(pltpu.get_tpu_info().vmem_capacity_bytes)
    except Exception:
        return 64 << 20


def _bytes_per_row(dim):
    """Rough per-row VMEM footprint: 2 x-buffers (double-buffered input block)
    + ~4 live f32 (T, D) intermediates (q, k, elementwise products) + the tiny
    (T, 1) column outputs."""
    return 4 * dim * 6 + 16


def _pick_tiling(batch, seq_len, row_cap, max_rows):
    """Choose seqs_per_tile so that tiles are sequence-aligned, 8-row aligned,
    within the VMEM-derived row cap, and (when batch allows) give >= 2 grid
    steps for v7x's two TensorCores."""
    n_rows = batch * seq_len
    # Preference: min(max_rows, row_cap); but one whole sequence per tile is
    # always allowed (the VMEM-fit check happens afterwards in the wrapper).
    target = max(seq_len, min(max_rows, row_cap))
    candidates = [d for d in range(1, batch + 1)
                  if batch % d == 0
                  and (d * seq_len) % 8 == 0
                  and d * seq_len <= target]
    if not candidates:
        # No 8-aligned sequence-aligned tile exists: single whole-array block
        # (block_shape == full array dims is always layout-legal).
        return batch, n_rows, 1
    multi = [d for d in candidates if batch // d >= 2]     # >=2 grid steps
    d = max(multi) if multi else max(candidates)
    return d, d * seq_len, batch // d


def _resident_spec(shape):
    """Whole-array block with a constant index_map, single-buffered: a second
    pipeline buffer for a block that never changes is pure VMEM waste."""
    index_map = lambda i: (0,) * len(shape)
    try:
        return pl.BlockSpec(shape, index_map, pipeline_mode=pl.Buffered(1))
    except TypeError:
        # Older JAX without pipeline_mode: accept the default double-buffer.
        return pl.BlockSpec(shape, index_map)


# --------------------------------------------------------------------------- #
# Wrapper
# --------------------------------------------------------------------------- #
def routing_forward(x, wq, bq, wk, bk, *, max_tile_rows=1024):
    """x: (B, S, D) f32.  wq/wk: (D, D) in PyTorch (out, in) layout.  bq/bk: (D,).

    Returns (p, b), both (B, S) f32, matching RoutingModule.forward.
    """
    B, S, D = x.shape
    n_rows = B * S

    # Weight prep: (out, in) -> (in, out) so the kernel does x @ W^T directly.
    # NOTE: in real use precompute/cache these at module init -- each .T is an
    # XLA copy of 4*D^2 bytes per call.
    wq_t = wq.T
    wk_t = wk.T
    bq2 = bq.reshape(1, D)
    bk2 = bk.reshape(1, D)

    # ---- VMEM budgeting ---------------------------------------------------
    cap = (_vmem_cap_bytes() * 3) // 4          # leave headroom (v7x: ~48 MiB)
    weight_bytes = 2 * D * D * 4 + 2 * D * 4    # single-buffered residents
    bpr = _bytes_per_row(D)
    tile_budget = max(1 << 20, cap - weight_bytes - (2 << 20))

    seqs_per_tile, tile_rows, num_tiles = _pick_tiling(
        B, S, tile_budget // bpr, max_tile_rows)
    assert tile_rows % S == 0 and num_tiles * tile_rows == n_rows  # no partials

    est_bytes = weight_bytes + tile_rows * bpr + (1 << 20)
    if est_bytes > cap:
        # TODO(synk): masked partial-sequence tile path for very long sequences.
        raise ValueError(
            f"RoutingModule Pallas tiling needs ~{est_bytes >> 20} MiB VMEM "
            f"(> {cap >> 20} MiB budget) for B={B}, S={S}, D={D}.")
    vmem_limit = int(min(cap, max(est_bytes, 16 << 20)))

    kernel = functools.partial(_routing_kernel, seq_len=S)

    p_flat = pl.pallas_call(
        kernel,
        out_shape=jax.ShapeDtypeStruct((n_rows, 1), jnp.float32),
        grid_spec=pltpu.PrefetchScalarGridSpec(
            num_scalar_prefetch=0,
            grid=(num_tiles,),
            in_specs=[
                pl.BlockSpec((tile_rows, D), lambda i: (i, 0)),  # x rows
                _resident_spec((D, D)),                          # Wq^T (resident)
                _resident_spec((D, D)),                          # Wk^T (resident)
                _resident_spec((1, D)),                          # bq   (resident)
                _resident_spec((1, D)),                          # bk   (resident)
            ],
            out_specs=pl.BlockSpec((tile_rows, 1), lambda i: (i, 0)),
        ),
        compiler_params=pltpu.CompilerParams(
            dimension_semantics=("parallel",),
            vmem_limit_bytes=vmem_limit),
    )(x.reshape(n_rows, D), wq_t, wk_t, bq2, bk2)

    p = p_flat.reshape(B, S)
    b = (p >= 0.5).astype(jnp.float32)   # trivial derivation of p; fused by XLA
    return p, b


# --------------------------------------------------------------------------- #
# Pure-JAX reference + test
# --------------------------------------------------------------------------- #
def _reference(x, wq, bq, wk, bk):
    """Pure-JAX reference mirroring the PyTorch forward (for verification)."""
    hp = lax.Precision.HIGHEST
    q = jnp.dot(x, wq.T, precision=hp) + bq
    k = jnp.dot(jnp.roll(x, 1, axis=1), wk.T, precision=hp) + bk
    eps = 1e-8
    dot = jnp.sum(q * k, axis=-1)
    qn = jnp.maximum(jnp.sqrt(jnp.sum(q * q, axis=-1)), eps)
    kn = jnp.maximum(jnp.sqrt(jnp.sum(k * k, axis=-1)), eps)
    p = 0.5 * (1.0 - dot / (qn * kn))
    p = p.at[:, 0].set(1.0)
    b = (p >= 0.5).astype(jnp.float32)
    return p, b


if __name__ == "__main__":
    B, S, D = 2, 8, 32   # batch=2, seq=8, hidden=32

    key = jax.random.PRNGKey(0)
    kx, kwq, kbq, kwk, kbk = jax.random.split(key, 5)

    x = jax.random.normal(kx, (B, S, D), dtype=jnp.float32)

    # Deterministic nn.Linear-style init: U(-1/sqrt(dim), 1/sqrt(dim)).
    bound = 1.0 / (D ** 0.5)
    wq = jax.random.uniform(kwq, (D, D), jnp.float32, -bound, bound)   # (out, in)
    bq = jax.random.uniform(kbq, (D,), jnp.float32, -bound, bound)
    wk = jax.random.uniform(kwk, (D, D), jnp.float32, -bound, bound)
    bk = jax.random.uniform(kbk, (D,), jnp.float32, -bound, bound)

    p, b = routing_forward(x, wq, bq, wk, bk)
    jax.block_until_ready((p, b))

    p_ref, b_ref = _reference(x, wq, bq, wk, bk)
    assert p.shape == (B, S) and b.shape == (B, S)
    assert jnp.allclose(p, p_ref, atol=1e-5, rtol=1e-5), \
        float(jnp.max(jnp.abs(p - p_ref)))
    assert jnp.array_equal(b, b_ref)

    print("KERNEL_OK")
</pallas_src>

<mosaic_0001>
module attributes {stable_mosaic.version = 11 : i64} {
  func.func @_routing_kernel(%arg0: i32, %arg1: memref<8x32xf32, #tpu.memory_space<vmem>>, %arg2: memref<32x32xf32, #tpu.memory_space<vmem>>, %arg3: memref<32x32xf32, #tpu.memory_space<vmem>>, %arg4: memref<1x32xf32, #tpu.memory_space<vmem>>, %arg5: memref<1x32xf32, #tpu.memory_space<vmem>>, %arg6: memref<8x1xf32, #tpu.memory_space<vmem>>) attributes {dimension_semantics = [#tpu.dimension_semantics<parallel>], iteration_bounds = array<i64: 2>, scalar_prefetch = 0 : i64, scratch_operands = 0 : i64, tpu.core_type = #tpu.core_type<tc>, window_params = [{transform_indices = @transform_0, window_bounds = array<i64: 8, 32>}, {pipeline_mode = #tpu.pipeline_mode<synchronous>, transform_indices = @transform_1, window_bounds = array<i64: 32, 32>}, {pipeline_mode = #tpu.pipeline_mode<synchronous>, transform_indices = @transform_2, window_bounds = array<i64: 32, 32>}, {pipeline_mode = #tpu.pipeline_mode<synchronous>, transform_indices = @transform_3, window_bounds = array<i64: 1, 32>}, {pipeline_mode = #tpu.pipeline_mode<synchronous>, transform_indices = @transform_4, window_bounds = array<i64: 1, 32>}, {transform_indices = @transform_5, window_bounds = array<i64: 8, 1>}]} {
    %c0 = arith.constant 0 : index
    %c0_0 = arith.constant 0 : index
    %0 = vector.load %arg1[%c0, %c0_0] : memref<8x32xf32, #tpu.memory_space<vmem>>, vector<8x32xf32>
    %c0_1 = arith.constant 0 : index
    %c0_2 = arith.constant 0 : index
    %1 = vector.load %arg2[%c0_1, %c0_2] : memref<32x32xf32, #tpu.memory_space<vmem>>, vector<32x32xf32>
    %cst = arith.constant dense<0.000000e+00> : vector<8x32xf32>
    %2 = tpu.matmul %0, %1, %cst {dimension_numbers = #tpu.dot_dimension_numbers<[1], [0], [0], [1], [0, 0, 1, 1], [], []>, precision = #tpu.contract_precision<fp32>} : vector<8x32xf32>, vector<32x32xf32>, vector<8x32xf32> -> vector<8x32xf32>
    %c0_3 = arith.constant 0 : index
    %c0_4 = arith.constant 0 : index
    %3 = vector.load %arg4[%c0_3, %c0_4] : memref<1x32xf32, #tpu.memory_space<vmem>>, vector<1x32xf32>
    %4 = vector.broadcast %3 : vector<1x32xf32> to vector<8x32xf32>
    %5 = arith.addf %2, %4 : vector<8x32xf32>
    %c0_5 = arith.constant 0 : index
    %c0_6 = arith.constant 0 : index
    %6 = vector.load %arg3[%c0_5, %c0_6] : memref<32x32xf32, #tpu.memory_space<vmem>>, vector<32x32xf32>
    %cst_7 = arith.constant dense<0.000000e+00> : vector<8x32xf32>
    %7 = tpu.matmul %0, %6, %cst_7 {dimension_numbers = #tpu.dot_dimension_numbers<[1], [0], [0], [1], [0, 0, 1, 1], [], []>, precision = #tpu.contract_precision<fp32>} : vector<8x32xf32>, vector<32x32xf32>, vector<8x32xf32> -> vector<8x32xf32>
    %c0_8 = arith.constant 0 : index
    %c0_9 = arith.constant 0 : index
    %8 = vector.load %arg5[%c0_8, %c0_9] : memref<1x32xf32, #tpu.memory_space<vmem>>, vector<1x32xf32>
    %9 = vector.broadcast %8 : vector<1x32xf32> to vector<8x32xf32>
    %10 = arith.addf %7, %9 : vector<8x32xf32>
    %c1_i32 = arith.constant 1 : i32
    %11 = tpu.dynamic_rotate %10 by %c1_i32 dim 0 : vector<8x32xf32>, i32 -> vector<8x32xf32>
    %12 = arith.mulf %5, %11 : vector<8x32xf32>
    %cst_10 = arith.constant dense<0.000000e+00> : vector<8xf32>
    %13 = vector.multi_reduction <add>, %12, %cst_10 [1] : vector<8x32xf32> to vector<8xf32>
    %14 = vector.shape_cast %13 : vector<8xf32> to vector<8x1xf32>
    %15 = arith.mulf %5, %5 : vector<8x32xf32>
    %cst_11 = arith.constant dense<0.000000e+00> : vector<8xf32>
    %16 = vector.multi_reduction <add>, %15, %cst_11 [1] : vector<8x32xf32> to vector<8xf32>
    %17 = vector.shape_cast %16 : vector<8xf32> to vector<8x1xf32>
    %18 = arith.mulf %11, %11 : vector<8x32xf32>
    %cst_12 = arith.constant dense<0.000000e+00> : vector<8xf32>
    %19 = vector.multi_reduction <add>, %18, %cst_12 [1] : vector<8x32xf32> to vector<8xf32>
    %20 = vector.shape_cast %19 : vector<8xf32> to vector<8x1xf32>
    %cst_13 = arith.constant 1.000000e-16 : f32
    %21 = vector.broadcast %cst_13 : f32 to vector<8x1xf32>
    %22 = arith.maximumf %17, %21 : vector<8x1xf32>
    %23 = math.rsqrt %22 : vector<8x1xf32>
    %24 = arith.mulf %14, %23 : vector<8x1xf32>
    %cst_14 = arith.constant 1.000000e-16 : f32
    %25 = vector.broadcast %cst_14 : f32 to vector<8x1xf32>
    %26 = arith.maximumf %20, %25 : vector<8x1xf32>
    %27 = math.rsqrt %26 : vector<8x1xf32>
    %28 = arith.mulf %24, %27 : vector<8x1xf32>
    %cst_15 = arith.constant 1.000000e+00 : f32
    %29 = vector.broadcast %cst_15 : f32 to vector<8x1xf32>
    %30 = arith.subf %29, %28 : vector<8x1xf32>
    %cst_16 = arith.constant 5.000000e-01 : f32
    %31 = vector.broadcast %cst_16 : f32 to vector<8x1xf32>
    %32 = arith.mulf %31, %30 : vector<8x1xf32>
    %33 = tpu.iota {dimensions = array<i32: 0>} : vector<8x1xi32>
    %c8_i32 = arith.constant 8 : i32
    %c0_i32 = arith.constant 0 : i32
    %34 = arith.cmpi eq, %c8_i32, %c0_i32 : i32
    %c1_i32_17 = arith.constant 1 : i32
    %35 = arith.select %34, %c1_i32_17, %c8_i32 : i32
    %36 = vector.broadcast %35 : i32 to vector<8x1xi32>
    %37 = arith.remsi %33, %36 : vector<8x1xi32>
    %c0_i32_18 = arith.constant 0 : i32
    %38 = vector.broadcast %c0_i32_18 : i32 to vector<8x1xi32>
    %39 = arith.cmpi ne, %37, %38 : vector<8x1xi32>
    %c0_i32_19 = arith.constant 0 : i32
    %40 = vector.broadcast %c0_i32_19 : i32 to vector<8x1xi32>
    %41 = arith.cmpi slt, %37, %40 : vector<8x1xi32>
    %c0_i32_20 = arith.constant 0 : i32
    %42 = arith.cmpi slt, %35, %c0_i32_20 : i32
    %43 = vector.broadcast %42 : i1 to vector<8x1xi1>
    %44 = vector.broadcast %43 : vector<8x1xi1> to vector<8x1xi1>
    %45 = arith.xori %41, %44 : vector<8x1xi1>
    %46 = arith.andi %45, %39 : vector<8x1xi1>
    %47 = vector.broadcast %35 : i32 to vector<8x1xi32>
    %48 = arith.addi %37, %47 : vector<8x1xi32>
    %49 = arith.select %46, %48, %37 : vector<8x1xi1>, vector<8x1xi32>
    %c0_i32_21 = arith.constant 0 : i32
    %50 = vector.broadcast %c0_i32_21 : i32 to vector<8x1xi32>
    %51 = arith.cmpi eq, %49, %50 : vector<8x1xi32>
    %cst_22 = arith.constant 1.000000e+00 : f32
    %52 = vector.broadcast %cst_22 : f32 to vector<8x1xf32>
    %53 = arith.select %51, %52, %32 : vector<8x1xi1>, vector<8x1xf32>
    %c0_23 = arith.constant 0 : index
    %c0_24 = arith.constant 0 : index
    %54 = vector.load %arg6[%c0_23, %c0_24] : memref<8x1xf32, #tpu.memory_space<vmem>>, vector<8x1xf32>
    tpu.vector_store %arg6[%c0_23, %c0_24], %53 {strides = array<i32>} : memref<8x1xf32, #tpu.memory_space<vmem>>, vector<8x1xf32>,
    return
  }
  func.func @transform_0(%arg0: i32) -> (i32, i32) {
    %c0_i32 = arith.constant 0 : i32
    %c0_i32_0 = arith.constant 0 : i32
    return %arg0, %c0_i32 : i32, i32
  }
  func.func @transform_1(%arg0: i32) -> (i32, i32) {
    %c0_i32 = arith.constant 0 : i32
    %c0_i32_0 = arith.constant 0 : i32
    %c0_i32_1 = arith.constant 0 : i32
    return %c0_i32, %c0_i32_0 : i32, i32
  }
  func.func @transform_2(%arg0: i32) -> (i32, i32) {
    %c0_i32 = arith.constant 0 : i32
    %c0_i32_0 = arith.constant 0 : i32
    %c0_i32_1 = arith.constant 0 : i32
    return %c0_i32, %c0_i32_0 : i32, i32
  }
  func.func @transform_3(%arg0: i32) -> (i32, i32) {
    %c0_i32 = arith.constant 0 : i32
    %c0_i32_0 = arith.constant 0 : i32
    %c0_i32_1 = arith.constant 0 : i32
    return %c0_i32, %c0_i32_0 : i32, i32
  }
  func.func @transform_4(%arg0: i32) -> (i32, i32) {
    %c0_i32 = arith.constant 0 : i32
    %c0_i32_0 = arith.constant 0 : i32
    %c0_i32_1 = arith.constant 0 : i32
    return %c0_i32, %c0_i32_0 : i32, i32
  }
  func.func @transform_5(%arg0: i32) -> (i32, i32) {
    %c0_i32 = arith.constant 0 : i32
    %c0_i32_0 = arith.constant 0 : i32
    return %arg0, %c0_i32 : i32, i32
  }
}

</mosaic_0001>

<bundles_post_ra>
// kernel: tpu_custom_call.1
= control target key start
LH: loop header
LB: loop body
LE: loop exit
PB: predicated region body
PF: predicated region fallthrough
CT: control target
= control target key end

     0   :  { %10 = vsyncpa [#allocation3], 0  ;;  %s2259_s0 = inlined_call_operand.hbm [shape: f32[16,32], index: 0, kind: input, shape index: {}]   ;;  %s2260_s1 = inlined_call_operand.hbm [shape: f32[32,32], index: 1, kind: input, shape index: {}]   ;;  %s2261_s2 = inlined_call_operand.hbm [shape: f32[32,32], index: 2, kind: input, shape index: {}]   ;;  %s2262_s3 = inlined_call_operand.vmem [shape: f32[1,32], index: 3, kind: input, shape index: {}]   ;;  %s2263_s4 = inlined_call_operand.vmem [shape: f32[1,32], index: 4, kind: input, shape index: {}]   ;;  %s2264_s5 = inlined_call_operand.vmem [shape: f32[16,1], index: 5, kind: output, shape index: {}]  }
   0x1   :  { %12 = vsyncpa [#allocation3 + $0x1], 0 }
   0x2   :  { %13 = vsyncpa [#allocation5], 0  ;;  %s1924_s18 = smov 0   ;;  %s1926_s19 = smov 0  }
   0x3   :  { %s1928_s20 = smov 0   ;;  %s1930_s21 = smov 0  }
   0x4 LB: > { %s1943_s22 = sadd.s32 4294967295, %s1884_s21   ;;  %p39_p0 = scmp.ne.s32.totalorder %s1876_s19, %s1872_s18  ;;  %s1884_s21 = sphi %s1930_s21, %s2279_s21   ;;  %s1880_s20 = sphi %s1928_s20, %s2278_s20   ;;  %s1876_s19 = sphi %s1926_s19, %s2277_s19   ;;  %s1872_s18 = sphi %s1924_s18, %s2276_s18  }
   0x5   : > { %p2265_p1 = scmp.eq.s32.totalorder %s1943_s22, 0  ;;  %p1390_p2 = scmp.ge.s32.totalorder %s1884_s21, 1 }
   0x6   : > { %p160_p3 = scmp.lt.s32.totalorder %s1884_s21, 3  ;;  %s1886_s25 = smov [#allocation4]  }
   0x7   : > { %p1951_p4 = por %p2265_p1, %p39_p0  ;;  %s172_s26 = sshll.u32 %s1886_s25, 4  ;;  %s173_s26 = int_to_ptr.vmem [resolvable:$true] %s172_s26 }
   0x8   : > { %p1955_p5 = pnand %p1390_p2, %p160_p3  ;;  %s1887_s28 = smov [#allocation6]  }
   0x9   : > { %s2268_s23 = scalar_select %p1951_p4, 1, 0 }
   0xa   : > { %s2269_s24 = scalar_select %p1955_p5, 1, 0 }
   0xb   : > { %p1701_p6 = pneg %p1955_p5  ;;  %s185_s29 = sshll.u32 %s1887_s28, 4  ;;  %s1967_s29 = int_to_ptr.vmem [resolvable:$true] %s185_s29 }
   0xc   : > { %s1760_s7 = scalar_lea.hbm %s2260_s1, 512 }
   0xd   : > { %p1963_p7 = pnand %p1701_p6, %p2265_p1  ;;  %p1761_p8 = scmp.ne.s32.totalorder %s2260_s1, %s1760_s7 }
   0xe   : > { %p1767_p12 = scmp.lt.u32.totalorder %s1760_s7, %s2260_s1 }
   0xf   : > { %p1762_p9 = pneg %p1963_p7 }
  0x11   : > { %p1763_p10 = pnand %p1762_p9, %p1761_p8 }
  0x13   : > { %p1764_p11 = pneg %p1763_p10 }
  0x15   : > { %p1769_p13 = pnand %p1767_p12, %p1764_p11 }
  0x17   : > { %1772 = shalt.err (!%p1769_p13)
}
  0x18   : > { %s1773_s12 = scalar_lea.vmem %s173_s26, 512  ;;  %p1781_p6 = scmp.lt.s32.totalorder %s173_s26, %s173_s26 }
  0x19   : > { %p1774_p0 = scmp.ne.s32.totalorder %s173_s26, %s1773_s12  ;;  %p1782_p1 = scmp.lt.s32.totalorder %s1773_s12, %s1773_s12 }
  0x1b   : > { %p1776_p2 = pnand %p1774_p0, %p1762_p9  ;;  %p1783_p4 = por %p1782_p1, %p1781_p6 }
  0x1d   : > { %p1777_p3 = pneg %p1776_p2 }
  0x1f   : > { %p1784_p5 = pnand %p1783_p4, %p1777_p3 }
  0x21   : > { %1787 = shalt.err (!%p1784_p5)
}
  0x22   : > { %s1888_s13 = smov 128   ;;  %s1889_s14 = smov 8  }
  0x23   : > { %1704 = dma.hbm_to_vmem [thread:$0]  (!%p1963_p7), %s2260_s1, 512, %s173_s26, [#allocation5], %s1888_s13, %s1888_s13, %s1889_s14  }
  0x24   : > { %s1788_s25 = scalar_lea.hbm %s2261_s2, 512 }
  0x25   : > { %p1789_p8 = scmp.ne.s32.totalorder %s2261_s2, %s1788_s25  ;;  %p1795_p5 = scmp.lt.u32.totalorder %s1788_s25, %s2261_s2 }
  0x27   : > { %p1791_p1 = pnand %p1789_p8, %p1762_p9 }
  0x29   : > { %p1792_p4 = pneg %p1791_p1 }
  0x2b   : > { %p1797_p10 = pnand %p1795_p5, %p1792_p4 }
  0x2d   : > { %1800 = shalt.err (!%p1797_p10)
}
  0x2e   : > { %s1801_s26 = scalar_lea.vmem %s1967_s29, 512  ;;  %p1809_p0 = scmp.lt.s32.totalorder %s1967_s29, %s1967_s29 }
  0x2f   : > { %p1802_p11 = scmp.ne.s32.totalorder %s1967_s29, %s1801_s26  ;;  %p1810_p2 = scmp.lt.s32.totalorder %s1801_s26, %s1801_s26 }
  0x31   : > { %p1804_p12 = pnand %p1802_p11, %p1762_p9  ;;  %p1811_p3 = por %p1810_p2, %p1809_p0 }
  0x33   : > { %p1805_p13 = pneg %p1804_p12 }
  0x35   : > { %p1812_p6 = pnand %p1811_p3, %p1805_p13 }
  0x37   : > { %1815 = shalt.err (!%p1812_p6)
}
  0x38   : > { %1707 = dma.hbm_to_vmem [thread:$0]  (!%p1963_p7), %s2261_s2, 512, %s1967_s29, [#allocation5], %s1888_s13, %s1888_s13, %s1889_s14  }
  0x39   : > { %s2017_s10 = sadd.s32 1, %s1884_s21   ;;  %s26_s11 = sadd.s32 1, %s1880_s20 }
  0x3a   : > { %s23_s27 = ssub.s32 %s1884_s21, %s2017_s10  ;;  %p33_p9 = scmp.ne.s32.totalorder %s1880_s20, %s1876_s19 }
  0x3b   : > { %p24_p8 = scmp.eq.s32.totalorder %s23_s27, 0  ;;  %p34_p1 = scmp.eq.s32.totalorder %s1884_s21, 0 }
  0x3c   : > { %p1714_p4 = scmp.lt.s32.totalorder %s1884_s21, 2  ;;  %s205_s12 = sand.u32 1, %s1880_s20  }
  0x3d   : > { %s2028_s15 = scalar_select %p24_p8, %s1880_s20, %s26_s11  }
  0x3e   : > { %p35_p5 = por %p34_p1, %p33_p9  ;;  %s1394_s16 = sshll.u32 %s205_s12, 3 }
  0x3f   : > { %s1395_s17 = sshll.u32 %s1884_s21, 7  ;;  %s209_s29 = scalar_lea.vmem [#allocation2], %s1394_s16 }
  0x40   : > { %s2034_s28 = scalar_lea.hbm %s2259_s0, %s1395_s17  ;;  %s216_s13 = sshll.u32 %s209_s29, 4  ;;  %s2040_s13 = int_to_ptr.vmem [resolvable:$true] %s216_s13 }
  0x41   : > { %p2036_p7 = pnand %p1714_p4, %p35_p5  ;;  %s206_s21 = scalar_lea.sflag [#allocation3], %s205_s12 }
  0x42   : > { %s1816_s30 = scalar_lea.hbm %s2034_s28, 128  ;;  %s1821_s26 = scalar_lea.hbm %s2259_s0, 256 }
  0x43   : > { %p1817_p10 = scmp.ne.s32.totalorder %s2034_s28, %s1816_s30  ;;  %p1818_p11 = pneg %p2036_p7 }
  0x44   : > { %p1822_p0 = scmp.lt.u32.totalorder %s2034_s28, %s2259_s0  ;;  %p1823_p2 = scmp.lt.u32.totalorder %s1821_s26, %s1816_s30 }
  0x45   : > { %p1819_p12 = pnand %p1818_p11, %p1817_p10  ;;  %p1825_p6 = scmp.lt.u32.totalorder %s1816_s30, %s2034_s28 }
  0x46   : > { %p1824_p3 = por %p1823_p2, %p1822_p0 }
  0x47   : > { %p1820_p13 = pneg %p1819_p12 }
  0x48   : > { %p1826_p9 = por %p1825_p6, %p1824_p3 }
  0x4a   : > { %p1827_p8 = pnand %p1826_p9, %p1820_p13 }
  0x4c   : > { %1830 = shalt.err (!%p1827_p8)
}
  0x4d   : > { %s1831_s11 = scalar_lea.vmem %s2040_s13, 128  ;;  %s1890_s27 = smov [#allocation2]  }
  0x4e   : > { %p1832_p1 = scmp.ne.s32.totalorder %s2040_s13, %s1831_s11  ;;  %s1836_s12 = sshll.u32 %s1890_s27, 4  ;;  %s1837_s12 = int_to_ptr.vmem [resolvable:$false] %s1836_s12 }
  0x4f   : > { %s1838_s16 = scalar_lea.vmem %s1837_s12, 256  ;;  %p1839_p10 = scmp.lt.s32.totalorder %s2040_s13, %s1837_s12 }
  0x50   : > { %p1834_p4 = pnand %p1832_p1, %p1818_p11  ;;  %p1840_p12 = scmp.lt.s32.totalorder %s1838_s16, %s1831_s11 }
  0x52   : > { %p1835_p5 = pneg %p1834_p4  ;;  %p1841_p0 = por %p1840_p12, %p1839_p10 }
  0x54   : > { %p1842_p2 = pnand %p1841_p0, %p1835_p5 }
  0x56   : > { %1845 = shalt.err (!%p1842_p2)
}
  0x57   : > { %1711 = dma.hbm_to_vmem [thread:$0]  (!%p2036_p7), %s2034_s28, 128, %s2040_s13, %s206_s21  }
  0x58   : > { %p2272_p13 = scmp.ne.s32.totalorder %s2269_s24, 0 }
  0x59   : > { %s227_s17 = sand.u32 (!%p2272_p13), 1, %s1876_s19   ;;  %p2273_p11 = scmp.ne.s32.totalorder (!%p2272_p13), %s2268_s23, 0 }
  0x5a   : > { %225 = sbr.rel (%p2272_p13) target bundleno = 542 (0x21e), region = 40  ;;  %s2070_s18 = sshll.u32 (!%p2272_p13), %s227_s17, 3 }
  0x5b   : > { %s228_s25 = scalar_lea.sflag (!%p2272_p13), [#allocation3], %s227_s17  ;;  %s231_s29 = scalar_lea.vmem (!%p2272_p13), [#allocation2], %s2070_s18 }
  0x61   : > { %1863 = dma.done.wait (%p2273_p11), %s228_s25, 128  }
  0x62   : > { %1865 = vsyncadd (%p2273_p11), %s228_s25, 4294967168  ;;  %p2274_p3 = scmp.eq.s32.totalorder %s1943_s22, 0 }
  0x64   : > { %1867 = dma.done.wait (%p2274_p3), [#allocation5], 1024   ;;  %p2275_p7 = pmov %p2274_p3 }
  0x65   : > { %v1891_v0 = vmov 0.0|0.0   ;;  %vm1892_vm0 = vmmov 0   ;;  %v1893_v1 = vmov 0.0   ;;  %v270_v2 = vld [vmem:[#allocation4] sm:$0xff]  ;;  %v271_v3 = vld [vmem:[#allocation4 + $0x8] sm:$0xff]  ;;  %vm281_vm1 = vcmask 261120  }
  0x66   : > { %1869 = vsyncadd (%p2275_p7), [#allocation5], 4294966272  ;;  %1597 = vmatprep.subr.bf16.mxu0 %v1891_v0  ;;  %1633 = vmatprep.subr.bf16.mxu1 %v1891_v0  ;;  %v770_v4 = vld [vmem:[#allocation6] sm:$0xff]  ;;  %v286_v5 = vand.u32 4294901760, %v270_v2  ;;  %v289_v6 = vand.u32 4294901760, %v271_v3  ;;  %v771_v7 = vld [vmem:[#allocation6 + $0x8] sm:$0xff] }
  0x67   : > { %1473 = vmatprep.mubr.msk.f32.mxu0 %vm1892_vm0, %v1893_v1  ;;  %1539 = vmatprep.mubr.msk.f32.mxu1 %vm1892_vm0, %v1893_v1  ;;  %v782_v8 = vand.u32 4294901760, %v770_v4  ;;  %v272_v9 = vld [vmem:[#allocation4 + $0x10] sm:$0xff]  ;;  %v273_v10 = vld [vmem:[#allocation4 + $0x18] sm:$0xff]  ;;  %v785_v11 = vand.u32 4294901760, %v771_v7  ;;  %p265_p6 = scmp.lt.s32.totalorder %s1943_s22, 1  ;;  %vm1303_vm3 = vcmask 7168  }
  0x68   : > { %v292_v12 = vand.u32 4294901760, %v272_v9  ;;  %v295_v13 = vand.u32 4294901760, %v273_v10  ;;  %v772_v14 = vld [vmem:[#allocation6 + $0x10] sm:$0xff]  ;;  %v773_v15 = vld [vmem:[#allocation6 + $0x18] sm:$0xff]  ;;  %v2087_v17 = vpack.c.bf16 %v289_v6, %v286_v5  ;;  %v2089_v18 = vsub.f32 %v270_v2, %v286_v5 }
  0x69   : > { %v269_v16 = vld [vmem:[%s231_s29] sm:$0xff]  ;;  %v2091_v19 = vsub.f32 %v271_v3, %v289_v6  ;;  %v2093_v20 = vsub.f32 %v770_v4, %v782_v8  ;;  %v2095_v21 = vpack.c.bf16 %v785_v11, %v782_v8  ;;  %v2097_v22 = vsub.f32 %v771_v7, %v785_v11  ;;  %s2281_s22 = smov (!%p265_p6, %s1943_s22), 1 }
  0x6a   : > { %v2099_v23 = vpack.c.bf16 %v295_v13, %v292_v12  ;;  %v2101_v24 = vsub.f32 %v272_v9, %v292_v12  ;;  %1599 = vmatpush3.bf16.msra.mxu0 %v2087_v17  ;;  %v2104_v25 = vsub.f32 %v273_v10, %v295_v13  ;;  %v788_v26 = vand.u32 4294901760, %v772_v14  ;;  %v1401_v11 = vld [vmem:[%s2262_s3] ss:$0 sm:$0xff]  ;;  %s1400_s14 = sshll.u32 %s2281_s22, 3 }
  0x6b   : > { %v791_v27 = vand.u32 4294901760, %v773_v15  ;;  %v283_v28 = vsel %vm281_vm1, %v269_v16, 0  ;;  %1635 = vmatpush3.bf16.msra.mxu1 %v2095_v21  ;;  %1600 = vmatprep.subr.bf16.mxu0 %v1891_v0  ;;  %v367_v30 = vand.u32 4294901760, %v2089_v18  ;;  %v374_v31 = vand.u32 4294901760, %v2091_v19  ;;  %s268_s6 = scalar_lea.vmem %s2264_s5, %s1400_s14 }
  0x6c   : > { %v2109_v29 = vand.u32 4294901760, %v283_v28  ;;  %v863_v32 = vand.u32 4294901760, %v2093_v20  ;;  %1636 = vmatprep.subr.bf16.mxu1 %v1891_v0  ;;  %v2117_v34 = vsub.f32 %v772_v14, %v788_v26  ;;  %v870_v36 = vand.u32 4294901760, %v2097_v22 }
  0x6d   : > { %v2115_v33 = vpack.c.bf16 %v791_v27, %v788_v26  ;;  %v2119_v35 = vsub.f32 %v773_v15, %v791_v27  ;;  %v368_v38 = vsub.f32 %v2089_v18, %v367_v30  ;;  %v375_v39 = vsub.f32 %v2091_v19, %v374_v31 }
  0x6e   : > { %v355_v37 = vsub.f32 %v283_v28, %v2109_v29  ;;  %v864_v40 = vsub.f32 %v2093_v20, %v863_v32  ;;  %1602 = vmatpush3.bf16.msra.mxu0 %v2099_v23  ;;  %v871_v41 = vsub.f32 %v2097_v22, %v870_v36  ;;  %v381_v42 = vand.u32 4294901760, %v2101_v24 }
  0x6f   : > { %v388_v43 = vand.u32 4294901760, %v2104_v25  ;;  %v877_v44 = vand.u32 4294901760, %v2117_v34  ;;  %1638 = vmatpush3.bf16.msra.mxu1 %v2115_v33  ;;  %1603 = vmatprep.subr.bf16.mxu0 %v1891_v0  ;;  %v369_v46 = vand.u32 4294901760, %v368_v38  ;;  %v376_v47 = vand.u32 4294901760, %v375_v39 }
  0x70   : > { %v2140_v45 = vand.u32 4294901760, %v355_v37  ;;  %v865_v48 = vand.u32 4294901760, %v864_v40  ;;  %1639 = vmatprep.subr.bf16.mxu1 %v1891_v0  ;;  %v872_v49 = vand.u32 4294901760, %v871_v41  ;;  %v382_v50 = vsub.f32 %v2101_v24, %v381_v42 }
  0x71   : > { %v389_v51 = vsub.f32 %v2104_v25, %v388_v43  ;;  %v878_v52 = vsub.f32 %v2117_v34, %v877_v44  ;;  %v884_v54 = vand.u32 4294901760, %v2119_v35  ;;  %v1604_v55 = vpack.c.bf16 %v376_v47, %v369_v46 }
  0x72   : > { %v357_v53 = vsub.f32 %v355_v37, %v2140_v45  ;;  %v1640_v56 = vpack.c.bf16 %v872_v49, %v865_v48  ;;  %v383_v57 = vand.u32 4294901760, %v382_v50  ;;  %v1610_v3 = vpack.c.bf16 %v2091_v19, %v2089_v18 }
  0x73   : > { %v390_v58 = vand.u32 4294901760, %v389_v51  ;;  %v879_v60 = vand.u32 4294901760, %v878_v52  ;;  %v885_v61 = vsub.f32 %v2119_v35, %v884_v54  ;;  %v1646_v4 = vpack.c.bf16 %v2097_v22, %v2093_v20 }
  0x74   : > { %v358_v59 = vand.u32 4294901760, %v357_v53  ;;  %v1613_v5 = vpack.c.bf16 %v2104_v25, %v2101_v24  ;;  %v1649_v6 = vpack.c.bf16 %v2119_v35, %v2117_v34  ;;  %v1622_v7 = vpack.c.bf16 %v374_v31, %v367_v30 }
  0x75   : > { %v886_v62 = vand.u32 4294901760, %v885_v61  ;;  %v1607_v63 = vpack.c.bf16 %v390_v58, %v383_v57  ;;  %v1658_v8 = vpack.c.bf16 %v870_v36, %v863_v32  ;;  %v1625_v9 = vpack.c.bf16 %v388_v43, %v381_v42 }
  0x76   : > { %1474 = vmatmul.mubr.f32.vlgmr.msra.gmra.mrb[0].mxu0 %v358_v59  ;;  %1540 = vmatmul.mubr.f32.vlgmr.msra.gmra.mrb[0].mxu1 %v358_v59  ;;  %v1661_v10 = vpack.c.bf16 %v884_v54, %v877_v44  ;;  %v1287_v28 = vlaneseq }
  0x77   : > { %1605 = vmatpush3.bf16.msra.mxu0 %v1604_v55  ;;  %1641 = vmatpush3.bf16.msra.mxu1 %v1640_v56  ;;  %v1643_v2 = vpack.c.bf16 %v886_v62, %v879_v60 }
  0x78   : > { %1606 = vmatprep.subr.bf16.mxu0 %v1891_v0  ;;  %1642 = vmatprep.subr.bf16.mxu1 %v1891_v0  ;;  %v1288_v30 = vshrl.u32 %v1287_v28, 7 }
  0x79   : > { %1484 = vmatprep.mubr.msk.f32.mxu0 %vm1892_vm0, %v1893_v1  ;;  %1550 = vmatprep.mubr.msk.f32.mxu1 %vm1892_vm0, %v1893_v1 }
  0x7a   : > { %v1293_v34 = vand.u32 7, %v1288_v30 }
  0x7b   : > { %1608 = vmatpush3.bf16.msra.mxu0 %v1607_v63  ;;  %1644 = vmatpush3.bf16.msra.mxu1 %v1643_v2 }
  0x7c   : > { %1609 = vmatprep.subr.bf16.mxu0 %v1891_v0  ;;  %1645 = vmatprep.subr.bf16.mxu1 %v1891_v0  ;;  %vm1301_vm2 = vcmp.eq.s32.totalorder %v1293_v34, 0 }
  0x7e   : > { %1485 = vmatmul.mubr.f32.vlgmr.msra.gmra.mrb[0].mxu0 %v2109_v29  ;;  %1551 = vmatmul.mubr.f32.vlgmr.msra.gmra.mrb[0].mxu1 %v2109_v29 }
  0x7f   : > { %1611 = vmatpush3.bf16.msra.mxu0 %v1610_v3  ;;  %1647 = vmatpush3.bf16.msra.mxu1 %v1646_v4 }
  0x80   : > { %1612 = vmatprep.subr.bf16.mxu0 %v1891_v0  ;;  %1648 = vmatprep.subr.bf16.mxu1 %v1891_v0 }
  0x81   : > { %1495 = vmatprep.mubr.msk.f32.mxu0 %vm1892_vm0, %v1893_v1  ;;  %1561 = vmatprep.mubr.msk.f32.mxu1 %vm1892_vm0, %v1893_v1 }
  0x83   : > { %1614 = vmatpush3.bf16.msra.mxu0 %v1613_v5  ;;  %1650 = vmatpush3.bf16.msra.mxu1 %v1649_v6 }
  0x84   : > { %1615 = vmatprep.subr.bf16.mxu0 %v1891_v0  ;;  %1651 = vmatprep.subr.bf16.mxu1 %v1891_v0 }
  0x86   : > { %1496 = vmatmul.mubr.f32.vlgmr.msra.gmra.mrb[0].mxu0 %v355_v37  ;;  %1562 = vmatmul.mubr.f32.vlgmr.msra.gmra.mrb[0].mxu1 %v355_v37 }
  0x87   : > { %1617 = vmatpush3.bf16.msra.mxu0 %v2087_v17  ;;  %1653 = vmatpush3.bf16.msra.mxu1 %v2095_v21 }
  0x88   : > { %1618 = vmatprep.subr.bf16.mxu0 %v1891_v0  ;;  %1654 = vmatprep.subr.bf16.mxu1 %v1891_v0 }
  0x89   : > { %1506 = vmatprep.mubr.msk.f32.mxu0 %vm1892_vm0, %v1893_v1  ;;  %1572 = vmatprep.mubr.msk.f32.mxu1 %vm1892_vm0, %v1893_v1 }
  0x8b   : > { %1620 = vmatpush3.bf16.msra.mxu0 %v2099_v23  ;;  %1656 = vmatpush3.bf16.msra.mxu1 %v2115_v33 }
  0x8c   : > { %1621 = vmatprep.subr.bf16.mxu0 %v1891_v0  ;;  %1657 = vmatprep.subr.bf16.mxu1 %v1891_v0 }
  0x8e   : > { %1507 = vmatmul.mubr.f32.vlgmr.msra.gmra.mrb[0].mxu0 %v2140_v45  ;;  %1573 = vmatmul.mubr.f32.vlgmr.msra.gmra.mrb[0].mxu1 %v2140_v45 }
  0x8f   : > { %1623 = vmatpush3.bf16.msra.mxu0 %v1622_v7  ;;  %1659 = vmatpush3.bf16.msra.mxu1 %v1658_v8 }
  0x90   : > { %1624 = vmatprep.subr.bf16.mxu0 %v1891_v0  ;;  %1660 = vmatprep.subr.bf16.mxu1 %v1891_v0 }
  0x91   : > { %1517 = vmatprep.mubr.msk.f32.mxu0 %vm1892_vm0, %v1893_v1  ;;  %1583 = vmatprep.mubr.msk.f32.mxu1 %vm1892_vm0, %v1893_v1 }
  0x93   : > { %1626 = vmatpush3.bf16.msra.mxu0 %v1625_v9  ;;  %1662 = vmatpush3.bf16.msra.mxu1 %v1661_v10 }
  0x94   : > { %1627 = vmatprep.subr.bf16.mxu0 %v1891_v0  ;;  %1663 = vmatprep.subr.bf16.mxu1 %v1891_v0 }
  0x96   : > { %1518 = vmatmul.mubr.f32.vlgmr.msra.gmra.mrb[0].mxu0 %v2109_v29  ;;  %1584 = vmatmul.mubr.f32.vlgmr.msra.gmra.mrb[0].mxu1 %v2109_v29 }
  0x97   : > { %1629 = vmatpush3.bf16.msra.mxu0 %v2087_v17  ;;  %1665 = vmatpush3.bf16.msra.mxu1 %v2095_v21 }
  0x98   : > { %1630 = vmatprep.subr.bf16.mxu0 %v1891_v0  ;;  %1666 = vmatprep.subr.bf16.mxu1 %v1891_v0  ;;  %v1402_v0 = vld [vmem:[%s2263_s4] ss:$0 sm:$0xff] }
  0x99   : > { %1528 = vmatprep.mubr.msk.f32.mxu0 %vm1892_vm0, %v1893_v1  ;;  %1594 = vmatprep.mubr.msk.f32.mxu1 %vm1892_vm0, %v1893_v1 }
  0x9b   : > { %1632 = vmatpush3.bf16.msra.mxu0 %v2099_v23  ;;  %1668 = vmatpush3.bf16.msra.mxu1 %v2115_v33 }
  0x9e   : > { %1529 = vmatmul.mubr.f32.vlgmr.msra.gmra.mrb[0].mxu0 %v2109_v29  ;;  %1595 = vmatmul.mubr.f32.vlgmr.msra.gmra.mrb[0].mxu1 %v2109_v29 }
 0x171   : > { %v766_v12 = vpop.f32.mrb[0].mxu0  ;;  %v1262_v13 = vpop.f32.mrb[0].mxu1 }
 0x172   : > { %v1669_v14 = vadd.f32 %v1401_v11, %v766_v12  ;;  %v1670_v1 = vadd.f32 %v1402_v0, %v1262_v13  ;;  %v1530_v15 = vpop.f32.mrb[1].mxu0  ;;  %v1596_v16 = vpop.f32.mrb[1].mxu1 }
 0x174   : > { %v1266_v17 = vrot.slane %v1670_v1, 7  ;;  %v1271_v18 = vmul.f32 %v1669_v14, %v1669_v14 }
 0x176   : > { %v1272_v19 = vsel %vm281_vm1, %v1271_v18, 0.0  ;;  %v1267_v20 = vmul.f32 %v1669_v14, %v1266_v17  ;;  %v1275_v21 = vmul.f32 %v1266_v17, %v1266_v17 }
 0x177   : > { %1273 = vadd.xlane.f32.xlu0 %v1272_v19 }
 0x178   : > { %v1268_v22 = vsel %vm281_vm1, %v1267_v20, 0.0  ;;  %v1276_v23 = vsel %vm281_vm1, %v1275_v21, 0.0 }
 0x179   : > { %1269 = vadd.xlane.f32.xlu1 %v1268_v22 }
 0x17b   : > { %1277 = vadd.xlane.f32.xlu0 %v1276_v23 }
 0x204   : > { %v1274_v24 = vpop.xlane.xlu0 %1273 }
 0x205   : > { %v1279_v25 = vmax.f32 %v1274_v24, 1e-16 }
 0x206   : > { %v1270_v31 = vpop.xlane.xlu1 %1269 }
 0x207   : > { %1756 = vrsqrt.f32 %v1279_v25 }
 0x208   : > { %v1278_v26 = vpop.xlane.xlu0 %1277 }
 0x209   : > { %v1282_v27 = vmax.f32 %v1278_v26, 1e-16 }
 0x20b   : > { %1758 = vrsqrt.f32 %v1282_v27 }
 0x211   : > { %v1757_v29 = vpop.eup %1756 }
 0x212   : > { %v1281_v32 = vmul.f32 %v1757_v29, %v1270_v31 }
 0x215   : > { %v1759_v33 = vpop.eup %1758 }
 0x216   : > { %v1284_v35 = vmul.f32 %v1759_v33, %v1281_v32 }
 0x218   : > { %v1285_v36 = vsub.f32 1.0, %v1284_v35 }
 0x21a   : > { %v1286_v37 = vmul.f32 0.5, %v1285_v36 }
 0x21c   : > { %v1302_v38 = vsel %vm1301_vm2, 1.0, %v1286_v37 }
 0x21d   : > { %1304 = vst.msk [vmem:[%s268_s6] sm:$0xff] %vm1303_vm3, %v1302_v38 }
 0x21e PF: > { %p16_p9 = scmp.ge.s32.totalorder %s2017_s10, 4   ;;  %s2276_s18 = smov %s1876_s19 }
 0x21f   : > { %s2277_s19 = smov %s1880_s20  ;;  %s2278_s20 = smov %s2028_s15 }
 0x220   : > { %s2279_s21 = smov %s2017_s10  ;;  %18 = sbr.rel (!%p16_p9) target bundleno = 4 (0x4), region = 88 }
 0x227   :  { %1324 = vsyncpa [#allocation3], 1 }
 0x228   :  { %1326 = vsyncpa [#allocation3 + $0x1], 1 }
 0x229   :  { %1327 = vsyncpa [#allocation5], 1 }

</bundles_post_ra>
